<compile_context>
chip_gen: v7x
topology: tpu7x:2x2x1
jax: 0.10.0
libtpu: 0.0.40
codegen_flags: <defaults>
</compile_context>

<pallas_src>
import functools
import math

import jax
import jax.numpy as jnp
from jax.experimental import pallas as pl
from jax.experimental.pallas import tpu as pltpu


HIDDEN = 128  # nn.Linear(D_obs, 128) feature width in the reference module


def _cdiv(a, b):
    return -(-a // b)


def _round_up(n, m):
    return _cdiv(n, m) * m


def dueling_dqn_kernel(x_ref, wf_ref, bf_ref, w1_ref, b1_ref, w2_ref, b2_ref,
                       q_ref, *, num_actions):
    """One batch tile: q[TB, A_pad] = dueling(x[TB, D])."""
    x = x_ref[...]                                     # bf16 [TB, D]

    # Shared feature trunk: Linear(D, H) + ReLU.  bf16 operands, f32
    # accumulate + bias; ReLU on the bf16 activations.
    h = jnp.dot(x, wf_ref[...], preferred_element_type=jnp.float32) + bf_ref[...]
    h = jnp.maximum(h.astype(jnp.bfloat16), 0)         # [TB, H] bf16

    # Fused head hidden layers: [adv_hidden | val_hidden] in one matmul.
    hw = jnp.dot(h, w1_ref[...], preferred_element_type=jnp.float32) + b1_ref[...]
    hw = jnp.maximum(hw.astype(jnp.bfloat16), 0)       # [TB, 2H] bf16

    # Fused block-diagonal output layer: cols [0,A) = advantage, col A = value,
    # cols > A are exactly-zero padding (lane-dense 128-wide matmul + store).
    out2 = jnp.dot(hw, w2_ref[...], preferred_element_type=jnp.float32) + b2_ref[...]
    val = out2[:, num_actions:num_actions + 1]         # [TB, 1]

    # Advantage mean without iota/mask: padded lanes are exactly zero and lane
    # A holds val, so the full-lane (XLU) reduce minus val is sum(advantage).
    adv_mean = (jnp.sum(out2, axis=1, keepdims=True) - val) * (1.0 / num_actions)

    # q = val + adv - adv.mean(1, keepdim=True); lanes >= A (and lane A) hold
    # garbage that the wrapper slices away (store stays unmasked / lane-dense).
    q_ref[...] = (val + out2 - adv_mean).astype(q_ref.dtype)


def pack_params(p, num_actions):
    """Pack torch-style per-layer params into the fused bf16 kernel layout."""
    bf16 = jnp.bfloat16
    H = p["wa1"].shape[0]
    A = num_actions
    a_pad = _round_up(A + 1, 128)

    w1cat = jnp.concatenate([p["wa1"], p["wv1"]], axis=1)       # [H, 2H]
    b1cat = jnp.concatenate([p["ba1"], p["bv1"]], axis=1)       # [1, 2H]

    # INVARIANT: columns > A of w2cat/b2cat must remain exactly zero and
    # column A must be the value head -- the kernel's advantage mean
    # (sum(out2) - val) / A depends on it.
    w2cat = jnp.zeros((2 * H, a_pad), jnp.float32)
    w2cat = w2cat.at[:H, :A].set(p["wa2"])                      # advantage cols
    w2cat = w2cat.at[H:, A:A + 1].set(p["wv2"])                 # value col
    b2cat = jnp.zeros((1, a_pad), jnp.float32)
    b2cat = b2cat.at[0, :A].set(p["ba2"][0])
    b2cat = b2cat.at[0, A].set(p["bv2"][0, 0])

    return {
        "wf": p["wf"].astype(bf16), "bf": p["bf"],
        "w1": w1cat.astype(bf16),   "b1": b1cat,
        "w2": w2cat.astype(bf16),   "b2": b2cat,
    }


def _choose_tiling(batch, block_b, min_steps=2):
    """Pick a batch tile TB (multiple of 16 sublanes for bf16 packing) that
    (a) yields >= `min_steps` grid steps whenever the batch allows it, so the
        'parallel' batch axis can be split across v7x's two TensorCores, and
    (b) divides the padded batch tightly (minimal padded-row waste)."""
    block_b = max(16, _round_up(block_b, 16))
    steps = _cdiv(batch, block_b)
    if batch > 16:
        steps = max(steps, min_steps)
    tb = min(block_b, _round_up(_cdiv(batch, steps), 16))
    b_pad = _round_up(batch, tb)
    return tb, b_pad


def dueling_dqn_forward(x, packed, num_actions, *, block_b=512,
                        out_dtype=jnp.float32):
    """q = dueling_dqn(x).  `out_dtype=jnp.bfloat16` halves output HBM traffic
    (useful on v5e) at the cost of bf16 Q-value precision."""
    B, D = x.shape
    H = HIDDEN
    A = num_actions
    a_pad = packed["w2"].shape[1]

    TB, B_pad = _choose_tiling(B, block_b)
    x_p = x.astype(jnp.bfloat16)
    if B_pad != B:
        x_p = jnp.pad(x_p, ((0, B_pad - B), (0, 0)))
    grid = (B_pad // TB,)

    args = (x_p, packed["wf"], packed["bf"], packed["w1"], packed["b1"],
            packed["w2"], packed["b2"])

    # D is intentionally left unpadded (block equals the full array dim): a
    # small K already costs a full MXU pass per 8 rows; padding D only adds
    # x DMA bytes with zero MXU benefit.
    in_specs = [
        pl.BlockSpec((TB, D), lambda i: (i, 0)),            # x: batch-tiled
        pl.BlockSpec((D, H), lambda i: (0, 0)),             # weights/biases:
        pl.BlockSpec((1, H), lambda i: (0, 0)),             # VMEM-resident via
        pl.BlockSpec((H, 2 * H), lambda i: (0, 0)),         # constant index_map
        pl.BlockSpec((1, 2 * H), lambda i: (0, 0)),
        pl.BlockSpec((2 * H, a_pad), lambda i: (0, 0)),
        pl.BlockSpec((1, a_pad), lambda i: (0, 0)),
    ]
    out_spec = pl.BlockSpec((TB, a_pad), lambda i: (i, 0))

    out_itemsize = jnp.dtype(out_dtype).itemsize
    flops = 2 * B_pad * (D * H + H * (2 * H) + (2 * H) * a_pad)
    bytes_accessed = (
        x_p.size * 2
        + sum(int(packed[k].size) * packed[k].dtype.itemsize
              for k in ("wf", "bf", "w1", "b1", "w2", "b2"))
        + B_pad * a_pad * out_itemsize
    )

    q_full = pl.pallas_call(
        functools.partial(dueling_dqn_kernel, num_actions=A),
        out_shape=jax.ShapeDtypeStruct((B_pad, a_pad), out_dtype),
        grid=grid,
        in_specs=in_specs,
        out_specs=out_spec,
        compiler_params=pltpu.CompilerParams(
            dimension_semantics=("parallel",)),
        cost_estimate=pl.CostEstimate(flops=flops, transcendentals=0,
                                      bytes_accessed=bytes_accessed),
    )(*args)

    return q_full[:B, :A]


def init_params(key, d_obs, num_actions, hidden=HIDDEN):
    """Orthogonal init (relu gain), zero biases, mirroring
    init_(module, orthogonal_, constant_(0), calculate_gain('relu'))."""
    gain = math.sqrt(2.0)
    ortho = jax.nn.initializers.orthogonal(scale=gain)
    ks = jax.random.split(key, 5)
    f32 = jnp.float32
    return {
        # weights stored [in, out] (pre-transposed relative to torch [out, in])
        "wf":  ortho(ks[0], (d_obs, hidden), f32),
        "bf":  jnp.zeros((1, hidden), f32),
        "wa1": ortho(ks[1], (hidden, hidden), f32),
        "ba1": jnp.zeros((1, hidden), f32),
        "wa2": ortho(ks[2], (hidden, num_actions), f32),
        "ba2": jnp.zeros((1, num_actions), f32),
        "wv1": ortho(ks[3], (hidden, hidden), f32),
        "bv1": jnp.zeros((1, hidden), f32),
        "wv2": ortho(ks[4], (hidden, 1), f32),
        "bv2": jnp.zeros((1, 1), f32),
    }


def dueling_dqn_reference(x, p):
    """Pure-JAX f32 reference of the module forward."""
    h = jax.nn.relu(x @ p["wf"] + p["bf"])
    adv = jax.nn.relu(h @ p["wa1"] + p["ba1"]) @ p["wa2"] + p["ba2"]
    val = jax.nn.relu(h @ p["wv1"] + p["bv1"]) @ p["wv2"] + p["bv2"]
    return val + adv - jnp.mean(adv, axis=1, keepdims=True)


def dueling_dqn_reference_bf16(x, p):
    """Reference with the same bf16-operand / f32-accumulate numerics as the
    kernel (isolates bf16 quantization from kernel bugs)."""
    bf16, f32 = jnp.bfloat16, jnp.float32

    def mm(a, w):
        return jnp.dot(a.astype(bf16), w.astype(bf16),
                       preferred_element_type=f32)

    h = jax.nn.relu(mm(x, p["wf"]) + p["bf"])
    a1 = jax.nn.relu(mm(h, p["wa1"]) + p["ba1"])
    v1 = jax.nn.relu(mm(h, p["wv1"]) + p["bv1"])
    adv = mm(a1, p["wa2"]) + p["ba2"]
    val = mm(v1, p["wv2"]) + p["bv2"]
    return val + adv - jnp.mean(adv, axis=1, keepdims=True)


if __name__ == "__main__":
    D_OBS, NUM_ACTIONS = 16, 6

    key = jax.random.PRNGKey(0)
    k_x, k_x2, k_p = jax.random.split(key, 3)

    params = init_params(k_p, D_OBS, NUM_ACTIONS)
    packed = pack_params(params, NUM_ACTIONS)

    # --- small batch (single grid step) ---
    B = 2
    x = jax.random.normal(k_x, (B, D_OBS), dtype=jnp.float32)
    q = dueling_dqn_forward(x, packed, NUM_ACTIONS)
    q = jax.block_until_ready(q)
    assert q.shape == (B, NUM_ACTIONS)

    q_ref_bf16 = dueling_dqn_reference_bf16(x, params)
    assert jnp.allclose(q, q_ref_bf16, atol=1e-3, rtol=1e-3), \
        "mismatch vs bf16-consistent reference (small batch)"
    q_ref = dueling_dqn_reference(x, params)
    assert jnp.allclose(q, q_ref, atol=1.5e-1, rtol=1e-1), \
        "mismatch vs f32 reference (small batch)"

    # --- larger batch (multi-step 'parallel' grid, padded batch rows) ---
    B2 = 100
    x2 = jax.random.normal(k_x2, (B2, D_OBS), dtype=jnp.float32)
    q2 = dueling_dqn_forward(x2, packed, NUM_ACTIONS)
    q2 = jax.block_until_ready(q2)
    assert q2.shape == (B2, NUM_ACTIONS)

    q2_ref_bf16 = dueling_dqn_reference_bf16(x2, params)
    assert jnp.allclose(q2, q2_ref_bf16, atol=1e-3, rtol=1e-3), \
        "mismatch vs bf16-consistent reference (multi-tile batch)"
    q2_ref = dueling_dqn_reference(x2, params)
    assert jnp.allclose(q2, q2_ref, atol=1.5e-1, rtol=1e-1), \
        "mismatch vs f32 reference (multi-tile batch)"

    print("KERNEL_OK")
</pallas_src>

<mosaic_0001>
module attributes {stable_mosaic.version = 11 : i64} {
  func.func @dueling_dqn_kernel(%arg0: i32, %arg1: memref<16x16xbf16, #tpu.memory_space<vmem>>, %arg2: memref<16x128xbf16, #tpu.memory_space<vmem>>, %arg3: memref<1x128xf32, #tpu.memory_space<vmem>>, %arg4: memref<128x256xbf16, #tpu.memory_space<vmem>>, %arg5: memref<1x256xf32, #tpu.memory_space<vmem>>, %arg6: memref<256x128xbf16, #tpu.memory_space<vmem>>, %arg7: memref<1x128xf32, #tpu.memory_space<vmem>>, %arg8: memref<16x128xf32, #tpu.memory_space<vmem>>) attributes {dimension_semantics = [#tpu.dimension_semantics<parallel>], iteration_bounds = array<i64: 1>, scalar_prefetch = 0 : i64, scratch_operands = 0 : i64, tpu.core_type = #tpu.core_type<tc>, window_params = [{transform_indices = @transform_0, window_bounds = array<i64: 16, 16>}, {pipeline_mode = #tpu.pipeline_mode<synchronous>, transform_indices = @transform_1, window_bounds = array<i64: 16, 128>}, {pipeline_mode = #tpu.pipeline_mode<synchronous>, transform_indices = @transform_2, window_bounds = array<i64: 1, 128>}, {pipeline_mode = #tpu.pipeline_mode<synchronous>, transform_indices = @transform_3, window_bounds = array<i64: 128, 256>}, {pipeline_mode = #tpu.pipeline_mode<synchronous>, transform_indices = @transform_4, window_bounds = array<i64: 1, 256>}, {pipeline_mode = #tpu.pipeline_mode<synchronous>, transform_indices = @transform_5, window_bounds = array<i64: 256, 128>}, {pipeline_mode = #tpu.pipeline_mode<synchronous>, transform_indices = @transform_6, window_bounds = array<i64: 1, 128>}, {transform_indices = @transform_7, window_bounds = array<i64: 16, 128>}]} {
    %c0 = arith.constant 0 : index
    %c0_0 = arith.constant 0 : index
    %0 = vector.load %arg1[%c0, %c0_0] : memref<16x16xbf16, #tpu.memory_space<vmem>>, vector<16x16xbf16>
    %c0_1 = arith.constant 0 : index
    %c0_2 = arith.constant 0 : index
    %1 = vector.load %arg2[%c0_1, %c0_2] : memref<16x128xbf16, #tpu.memory_space<vmem>>, vector<16x128xbf16>
    %cst = arith.constant dense<0.000000e+00> : vector<16x128xf32>
    %2 = tpu.matmul %0, %1, %cst {dimension_numbers = #tpu.dot_dimension_numbers<[1], [0], [0], [1], [0, 0, 1, 1], [], []>} : vector<16x16xbf16>, vector<16x128xbf16>, vector<16x128xf32> -> vector<16x128xf32>
    %c0_3 = arith.constant 0 : index
    %c0_4 = arith.constant 0 : index
    %3 = vector.load %arg3[%c0_3, %c0_4] : memref<1x128xf32, #tpu.memory_space<vmem>>, vector<1x128xf32>
    %4 = vector.broadcast %3 : vector<1x128xf32> to vector<16x128xf32>
    %5 = arith.addf %2, %4 : vector<16x128xf32>
    %6 = arith.truncf %5 : vector<16x128xf32> to vector<16x128xbf16>
    %cst_5 = arith.constant 0.000000e+00 : bf16
    %7 = vector.broadcast %cst_5 : bf16 to vector<16x128xbf16>
    %8 = arith.maximumf %6, %7 : vector<16x128xbf16>
    %c0_6 = arith.constant 0 : index
    %c0_7 = arith.constant 0 : index
    %9 = vector.load %arg4[%c0_6, %c0_7] : memref<128x256xbf16, #tpu.memory_space<vmem>>, vector<128x256xbf16>
    %cst_8 = arith.constant dense<0.000000e+00> : vector<16x256xf32>
    %10 = tpu.matmul %8, %9, %cst_8 {dimension_numbers = #tpu.dot_dimension_numbers<[1], [0], [0], [1], [0, 0, 1, 1], [], []>} : vector<16x128xbf16>, vector<128x256xbf16>, vector<16x256xf32> -> vector<16x256xf32>
    %c0_9 = arith.constant 0 : index
    %c0_10 = arith.constant 0 : index
    %11 = vector.load %arg5[%c0_9, %c0_10] : memref<1x256xf32, #tpu.memory_space<vmem>>, vector<1x256xf32>
    %12 = vector.broadcast %11 : vector<1x256xf32> to vector<16x256xf32>
    %13 = arith.addf %10, %12 : vector<16x256xf32>
    %14 = arith.truncf %13 : vector<16x256xf32> to vector<16x256xbf16>
    %cst_11 = arith.constant 0.000000e+00 : bf16
    %15 = vector.broadcast %cst_11 : bf16 to vector<16x256xbf16>
    %16 = arith.maximumf %14, %15 : vector<16x256xbf16>
    %c0_12 = arith.constant 0 : index
    %c0_13 = arith.constant 0 : index
    %17 = vector.load %arg6[%c0_12, %c0_13] : memref<256x128xbf16, #tpu.memory_space<vmem>>, vector<256x128xbf16>
    %cst_14 = arith.constant dense<0.000000e+00> : vector<16x128xf32>
    %18 = tpu.matmul %16, %17, %cst_14 {dimension_numbers = #tpu.dot_dimension_numbers<[1], [0], [0], [1], [0, 0, 1, 1], [], []>} : vector<16x256xbf16>, vector<256x128xbf16>, vector<16x128xf32> -> vector<16x128xf32>
    %c0_15 = arith.constant 0 : index
    %c0_16 = arith.constant 0 : index
    %19 = vector.load %arg7[%c0_15, %c0_16] : memref<1x128xf32, #tpu.memory_space<vmem>>, vector<1x128xf32>
    %20 = vector.broadcast %19 : vector<1x128xf32> to vector<16x128xf32>
    %21 = arith.addf %18, %20 : vector<16x128xf32>
    %22 = vector.extract_strided_slice %21 {offsets = [0, 6], sizes = [16, 1], strides = [1, 1]} : vector<16x128xf32> to vector<16x1xf32>
    %cst_17 = arith.constant dense<0.000000e+00> : vector<16xf32>
    %23 = vector.multi_reduction <add>, %21, %cst_17 [1] : vector<16x128xf32> to vector<16xf32>
    %24 = vector.shape_cast %23 : vector<16xf32> to vector<16x1xf32>
    %25 = arith.subf %24, %22 : vector<16x1xf32>
    %cst_18 = arith.constant 0.166666672 : f32
    %26 = vector.broadcast %cst_18 : f32 to vector<16x1xf32>
    %27 = arith.mulf %25, %26 : vector<16x1xf32>
    %28 = vector.broadcast %22 : vector<16x1xf32> to vector<16x128xf32>
    %29 = arith.addf %28, %21 : vector<16x128xf32>
    %30 = vector.broadcast %27 : vector<16x1xf32> to vector<16x128xf32>
    %31 = arith.subf %29, %30 : vector<16x128xf32>
    %c0_19 = arith.constant 0 : index
    %c0_20 = arith.constant 0 : index
    %32 = vector.load %arg8[%c0_19, %c0_20] : memref<16x128xf32, #tpu.memory_space<vmem>>, vector<16x128xf32>
    tpu.vector_store %arg8[%c0_19, %c0_20], %31 {strides = array<i32>} : memref<16x128xf32, #tpu.memory_space<vmem>>, vector<16x128xf32>,
    return
  }
  func.func @transform_0(%arg0: i32) -> (i32, i32) {
    %c0_i32 = arith.constant 0 : i32
    %c0_i32_0 = arith.constant 0 : i32
    return %arg0, %c0_i32 : i32, i32
  }
  func.func @transform_1(%arg0: i32) -> (i32, i32) {
    %c0_i32 = arith.constant 0 : i32
    %c0_i32_0 = arith.constant 0 : i32
    %c0_i32_1 = arith.constant 0 : i32
    return %c0_i32, %c0_i32_0 : i32, i32
  }
  func.func @transform_2(%arg0: i32) -> (i32, i32) {
    %c0_i32 = arith.constant 0 : i32
    %c0_i32_0 = arith.constant 0 : i32
    %c0_i32_1 = arith.constant 0 : i32
    return %c0_i32, %c0_i32_0 : i32, i32
  }
  func.func @transform_3(%arg0: i32) -> (i32, i32) {
    %c0_i32 = arith.constant 0 : i32
    %c0_i32_0 = arith.constant 0 : i32
    %c0_i32_1 = arith.constant 0 : i32
    return %c0_i32, %c0_i32_0 : i32, i32
  }
  func.func @transform_4(%arg0: i32) -> (i32, i32) {
    %c0_i32 = arith.constant 0 : i32
    %c0_i32_0 = arith.constant 0 : i32
    %c0_i32_1 = arith.constant 0 : i32
    return %c0_i32, %c0_i32_0 : i32, i32
  }
  func.func @transform_5(%arg0: i32) -> (i32, i32) {
    %c0_i32 = arith.constant 0 : i32
    %c0_i32_0 = arith.constant 0 : i32
    %c0_i32_1 = arith.constant 0 : i32
    return %c0_i32, %c0_i32_0 : i32, i32
  }
  func.func @transform_6(%arg0: i32) -> (i32, i32) {
    %c0_i32 = arith.constant 0 : i32
    %c0_i32_0 = arith.constant 0 : i32
    %c0_i32_1 = arith.constant 0 : i32
    return %c0_i32, %c0_i32_0 : i32, i32
  }
  func.func @transform_7(%arg0: i32) -> (i32, i32) {
    %c0_i32 = arith.constant 0 : i32
    %c0_i32_0 = arith.constant 0 : i32
    return %arg0, %c0_i32 : i32, i32
  }
}

</mosaic_0001>

<bundles_post_ra>
// kernel: tpu_custom_call.1
= control target key start
LH: loop header
LB: loop body
LE: loop exit
PB: predicated region body
PF: predicated region fallthrough
CT: control target
= control target key end

     0   :  { %12 = vsyncpa [#allocation3], 0  ;;  %s922_s0 = inlined_call_operand.hbm [shape: bf16[16,16], index: 0, kind: input, shape index: {}]   ;;  %s923_s1 = inlined_call_operand.hbm [shape: bf16[16,128], index: 1, kind: input, shape index: {}]   ;;  %s924_s2 = inlined_call_operand.vmem [shape: f32[1,128], index: 2, kind: input, shape index: {}]   ;;  %s925_s3 = inlined_call_operand.hbm [shape: bf16[128,256], index: 3, kind: input, shape index: {}]   ;;  %s926_s4 = inlined_call_operand.vmem [shape: f32[1,256], index: 4, kind: input, shape index: {}]   ;;  %s927_s5 = inlined_call_operand.hbm [shape: bf16[256,128], index: 5, kind: input, shape index: {}]   ;;  %s928_s6 = inlined_call_operand.vmem [shape: f32[1,128], index: 6, kind: input, shape index: {}]   ;;  %s929_s7 = inlined_call_operand.hbm [shape: f32[16,128], index: 7, kind: output, shape index: {}]  }
   0x1   :  { %13 = vsyncpa [#allocation6], 0 }
   0x2   :  { %14 = vsyncpa [#allocation9], 0 }
   0x3   :  { %15 = vsyncpa [#allocation4], 0  ;;  %s778_s24 = smov [#allocation5]   ;;  %s779_s26 = smov [#allocation2]  }
   0x4   :  { %s33_s25 = sshll.u32 %s778_s24, 4  ;;  %s21_s27 = sshll.u32 %s779_s26, 4  ;;  %s34_s25 = int_to_ptr.vmem [resolvable:$true] %s33_s25  ;;  %s831_s27 = int_to_ptr.vmem [resolvable:$true] %s21_s27 }
   0x5   :  { %s660_s30 = scalar_lea.hbm %s923_s1, 128 }
   0x6   :  { %p661_p0 = scmp.ne.s32.totalorder %s923_s1, %s660_s30  ;;  %p664_p1 = scmp.lt.u32.totalorder %s660_s30, %s923_s1 }
   0x8   :  { %p666_p2 = pnand %p664_p1, %p661_p0 }
   0xa   :  { %669 = shalt.err (!%p666_p2)
}
   0xb   :  { %s670_s12 = scalar_lea.vmem %s34_s25, 128  ;;  %p675_p4 = scmp.lt.s32.totalorder %s34_s25, %s34_s25 }
   0xc   :  { %p671_p3 = scmp.ne.s32.totalorder %s34_s25, %s670_s12  ;;  %p676_p5 = scmp.lt.s32.totalorder %s670_s12, %s670_s12 }
   0xe   :  { %p677_p6 = por %p676_p5, %p675_p4 }
  0x10   :  { %p678_p7 = pnand %p677_p6, %p671_p3 }
  0x12   :  { %681 = shalt.err (!%p678_p7)
}
  0x13   :  { %s780_s13 = smov 64   ;;  %s781_s14 = smov 4  }
  0x14   :  { %39 = dma.hbm_to_vmem [thread:$0]  %s923_s1, 128, %s34_s25, [#allocation6], %s780_s13, %s780_s13, %s781_s14  }
  0x15   :  { %s682_s19 = scalar_lea.hbm %s922_s0, 128 }
  0x16   :  { %p683_p8 = scmp.ne.s32.totalorder %s922_s0, %s682_s19  ;;  %p686_p9 = scmp.lt.u32.totalorder %s682_s19, %s922_s0 }
  0x18   :  { %p688_p10 = pnand %p686_p9, %p683_p8 }
  0x1a   :  { %691 = shalt.err (!%p688_p10)
}
  0x1b   :  { %s692_s24 = scalar_lea.vmem %s831_s27, 128  ;;  %p697_p12 = scmp.lt.s32.totalorder %s831_s27, %s831_s27 }
  0x1c   :  { %p693_p11 = scmp.ne.s32.totalorder %s831_s27, %s692_s24  ;;  %p698_p13 = scmp.lt.s32.totalorder %s692_s24, %s692_s24 }
  0x1e   :  { %p699_p0 = por %p698_p13, %p697_p12 }
  0x20   :  { %p700_p1 = pnand %p699_p0, %p693_p11 }
  0x22   :  { %703 = shalt.err (!%p700_p1)
}
  0x23   :  { %27 = dma.hbm_to_vmem [thread:$0]  %s922_s0, 128, %s831_s27, [#allocation3], %s780_s13, %s780_s13, %s781_s14  }
  0x24   :  { %s782_s26 = smov [#allocation7]   ;;  %s704_s8 = scalar_lea.hbm %s925_s3, 2048 }
  0x25   :  { %s47_s28 = sshll.u32 %s782_s26, 4  ;;  %p705_p2 = scmp.ne.s32.totalorder %s925_s3, %s704_s8  ;;  %s48_s28 = int_to_ptr.vmem [resolvable:$true] %s47_s28 }
  0x26   :  { %p708_p3 = scmp.lt.u32.totalorder %s704_s8, %s925_s3 }
  0x28   :  { %p710_p4 = pnand %p708_p3, %p705_p2 }
  0x2a   :  { %713 = shalt.err (!%p710_p4)
}
  0x2b   :  { %s714_s15 = scalar_lea.vmem %s48_s28, 2048  ;;  %p719_p6 = scmp.lt.s32.totalorder %s48_s28, %s48_s28 }
  0x2c   :  { %p715_p5 = scmp.ne.s32.totalorder %s48_s28, %s714_s15  ;;  %p720_p7 = scmp.lt.s32.totalorder %s714_s15, %s714_s15 }
  0x2e   :  { %p721_p8 = por %p720_p7, %p719_p6 }
  0x30   :  { %p722_p9 = pnand %p721_p8, %p715_p5 }
  0x32   :  { %725 = shalt.err (!%p722_p9)
}
  0x33   :  { %s783_s0 = smov 128   ;;  %s784_s27 = smov 8  }
  0x34   :  { %53 = dma.hbm_to_vmem [thread:$0]  %s925_s3, 2048, %s48_s28, [#allocation6], %s783_s0, %s783_s0, %s784_s27  }
  0x35   :  { %s785_s18 = smov [#allocation8]   ;;  %s726_s22 = scalar_lea.hbm %s927_s5, 2048 }
  0x36   :  { %s61_s19 = sshll.u32 %s785_s18, 4  ;;  %p727_p10 = scmp.ne.s32.totalorder %s927_s5, %s726_s22  ;;  %s62_s19 = int_to_ptr.vmem [resolvable:$true] %s61_s19 }
  0x37   :  { %p730_p11 = scmp.lt.u32.totalorder %s726_s22, %s927_s5 }
  0x39   :  { %p732_p12 = pnand %p730_p11, %p727_p10 }
  0x3b   :  { %735 = shalt.err (!%p732_p12)
}
  0x3c   :  { %s736_s26 = scalar_lea.vmem %s62_s19, 2048  ;;  %p741_p0 = scmp.lt.s32.totalorder %s62_s19, %s62_s19 }
  0x3d   :  { %p737_p13 = scmp.ne.s32.totalorder %s62_s19, %s736_s26  ;;  %p742_p1 = scmp.lt.s32.totalorder %s736_s26, %s736_s26 }
  0x3f   :  { %p743_p2 = por %p742_p1, %p741_p0 }
  0x41   :  { %p744_p3 = pnand %p743_p2, %p737_p13 }
  0x43   :  { %747 = shalt.err (!%p744_p3)
}
  0x44   :  { %67 = dma.hbm_to_vmem [thread:$0]  %s927_s5, 2048, %s62_s19, [#allocation9], %s780_s13, %s780_s13, %s781_s14  }
  0x45   :  { %770 = dma.done.wait [#allocation3], 128  }
  0x46   :  { %771 = vsyncadd [#allocation3], 4294967168 }
  0x47   :  { %772 = dma.done.wait [#allocation6], 2176  }
  0x48   :  { %773 = vsyncadd [#allocation6], 4294965120 }
  0x49   :  { %774 = dma.done.wait [#allocation9], 2048  }
  0x4a   :  { %775 = vsyncadd [#allocation9], 4294965248  ;;  %v786_v0 = vmov 0.0   ;;  %vm787_vm0 = vmmov 0   ;;  %v618_v1 = vld [vmem:[#allocation5] sm:$0xff]   ;;  %v619_v2 = vld [vmem:[#allocation2] sm:$0xff]   ;;  %v170_v45 = vlaneseq }
  0x4b   :  { %597 = vmatprep.subr.bf16.mxu0 %v786_v0  ;;  %599 = vmatprep.mubr.msk.bf16.mxu0 %vm787_vm0, %v786_v0  ;;  %vm105_vm1 = vcmask 130048   ;;  %v620_v3 = vld [vmem:[#allocation7 + $0x4] ss:$8 sps:$4 sm:$0xff]   ;;  %v622_v4 = vld [vmem:[#allocation7] ss:$8 sps:$4 sm:$0xff]   ;;  %v788_v19 = vmov 0  }
  0x4c   :  { %598 = vmatpush3.bf16.msra.mxu0 %v618_v1  ;;  %260 = vmatprep.subr.bf16.mxu1 %v620_v3  ;;  %v623_v5 = vld [vmem:[#allocation7 + $0x14] ss:$8 sps:$4 sm:$0xff]   ;;  %v625_v6 = vld [vmem:[#allocation7 + $0x10] ss:$8 sps:$4 sm:$0xff]   ;;  %v626_v7 = vld [vmem:[#allocation7 + $0x24] ss:$8 sps:$4 sm:$0xff]  }
  0x4d   :  { %261 = vmatpush1.bf16.msra.mxu1 %v622_v4  ;;  %v628_v8 = vld [vmem:[#allocation7 + $0x20] ss:$8 sps:$4 sm:$0xff]   ;;  %v629_v9 = vld [vmem:[#allocation7 + $0x34] ss:$8 sps:$4 sm:$0xff]   ;;  %v631_v10 = vld [vmem:[#allocation7 + $0x30] ss:$8 sps:$4 sm:$0xff]   ;;  %292 = vmatprep.mubr.bf16.mxu1 %v788_v19 }
  0x4e   :  { %262 = vmatprep.subr.bf16.mxu1 %v623_v5  ;;  %v632_v11 = vld [vmem:[#allocation7 + $0x44] ss:$8 sps:$4 sm:$0xff]   ;;  %v634_v12 = vld [vmem:[#allocation7 + $0x40] ss:$8 sps:$4 sm:$0xff]   ;;  %v635_v13 = vld [vmem:[#allocation7 + $0x54] ss:$8 sps:$4 sm:$0xff]  }
  0x4f   :  { %600 = vmatmul.mubr.msk.bf16.vlgmr.msra.gmra.mrb[0].mxu0 %vm105_vm1, %v619_v2  ;;  %v637_v14 = vld [vmem:[#allocation7 + $0x50] ss:$8 sps:$4 sm:$0xff]   ;;  %v638_v15 = vld [vmem:[#allocation7 + $0x64] ss:$8 sps:$4 sm:$0xff]   ;;  %v640_v16 = vld [vmem:[#allocation7 + $0x60] ss:$8 sps:$4 sm:$0xff]  }
  0x50   :  { %v641_v17 = vld [vmem:[#allocation7 + $0x74] ss:$8 sps:$4 sm:$0xff]   ;;  %v643_v18 = vld [vmem:[#allocation7 + $0x70] ss:$8 sps:$4 sm:$0xff]   ;;  %v644_v20 = vld [vmem:[#allocation8 + $0x40] sm:$0xff]   ;;  %v171_v46 = vshrl.u32 %v170_v45, 7 }
  0x51   :  { %263 = vmatpush1.bf16.msra.mxu1 %v625_v6  ;;  %v645_v21 = vld [vmem:[#allocation8] sm:$0xff]   ;;  %v646_v22 = vld [vmem:[#allocation8 + $0x48] sm:$0xff]   ;;  %575 = vmatprep.subr.bf16.mxu0 %v644_v20  ;;  %v648_v24 = vld [vmem:[#allocation8 + $0x50] sm:$0xff]   ;;  %v789_v0 = vmov 6  }
  0x52   :  { %264 = vmatprep.subr.bf16.mxu1 %v626_v7  ;;  %576 = vmatpush3.bf16.msra.mxu0 %v645_v21  ;;  %v647_v23 = vld [vmem:[#allocation8 + $0x8] sm:$0xff]   ;;  %v649_v25 = vld [vmem:[#allocation8 + $0x10] sm:$0xff]   ;;  %v650_v26 = vld [vmem:[#allocation8 + $0x58] sm:$0xff]   ;;  %v172_v47 = vsub.s32 0, %v171_v46  ;;  %v176_v49 = vsub.s32 1, %v171_v46 }
  0x53   :  { %577 = vmatprep.subr.bf16.mxu0 %v646_v22  ;;  %v651_v27 = vld [vmem:[#allocation8 + $0x18] sm:$0xff]   ;;  %v652_v28 = vld [vmem:[#allocation8 + $0x60] sm:$0xff]   ;;  %v654_v30 = vld [vmem:[#allocation8 + $0x68] sm:$0xff]   ;;  %616 = vset.pattern.permute.xlu1 %v789_v0 }
  0x54   :  { %v653_v29 = vld [vmem:[#allocation8 + $0x20] sm:$0xff]   ;;  %v536_v31 = vld [vmem:[%s924_s2] ss:$0 sm:$0xff]  ;;  %v655_v40 = vld [vmem:[#allocation8 + $0x28] sm:$0xff]   ;;  %617 = vset.pattern.permute.xlu0 %v789_v0 }
  0x55   :  { %265 = vmatpush1.bf16.msra.mxu1 %v628_v8  ;;  %v656_v41 = vld [vmem:[#allocation8 + $0x70] sm:$0xff]   ;;  %v658_v43 = vld [vmem:[#allocation8 + $0x78] sm:$0xff]  }
  0x56   :  { %266 = vmatprep.subr.bf16.mxu1 %v629_v9  ;;  %578 = vmatpush3.bf16.msra.mxu0 %v647_v23  ;;  %v657_v42 = vld [vmem:[#allocation8 + $0x30] sm:$0xff]   ;;  %v659_v44 = vld [vmem:[#allocation8 + $0x38] sm:$0xff]  }
  0x57   :  { %579 = vmatprep.subr.bf16.mxu0 %v648_v24  ;;  %v168_v48 = vld [vmem:[%s926_s4] sm:$0x3] }
  0x58   :  { %v173_v50 = vrot.slane %v168_v48, %v172_v47  ;;  %v177_v52 = vrot.slane %v168_v48, %v176_v49  ;;  %v556_v2 = vld [vmem:[%s928_s6] ss:$0 sm:$0xff]  ;;  %s790_s6 = smov [#allocation10]  }
  0x59   :  { %267 = vmatpush1.bf16.msra.mxu1 %v631_v10  ;;  %s522_s30 = sshll.u32 %s790_s6, 4  ;;  %s523_s30 = int_to_ptr.vmem [resolvable:$true] %s522_s30 }
  0x5a   :  { %268 = vmatprep.subr.bf16.mxu1 %v632_v11  ;;  %580 = vmatpush3.bf16.msra.mxu0 %v649_v25  ;;  %s748_s8 = scalar_lea.vmem %s523_s30, 256  ;;  %p753_p5 = scmp.lt.s32.totalorder %s523_s30, %s523_s30 }
  0x5b   :  { %581 = vmatprep.subr.bf16.mxu0 %v650_v26  ;;  %p749_p4 = scmp.ne.s32.totalorder %s523_s30, %s748_s8  ;;  %p754_p6 = scmp.lt.s32.totalorder %s748_s8, %s748_s8 }
  0x5d   :  { %269 = vmatpush1.bf16.msra.mxu1 %v634_v12  ;;  %p755_p7 = por %p754_p6, %p753_p5 }
  0x5e   :  { %270 = vmatprep.subr.bf16.mxu1 %v635_v13  ;;  %582 = vmatpush3.bf16.msra.mxu0 %v651_v27 }
  0x5f   :  { %583 = vmatprep.subr.bf16.mxu0 %v652_v28  ;;  %p756_p8 = pnand %p755_p7, %p749_p4 }
  0x61   :  { %271 = vmatpush1.bf16.msra.mxu1 %v637_v14 }
  0x62   :  { %272 = vmatprep.subr.bf16.mxu1 %v638_v15  ;;  %584 = vmatpush3.bf16.msra.mxu0 %v653_v29 }
  0x63   :  { %585 = vmatprep.subr.bf16.mxu0 %v654_v30 }
  0x65   :  { %273 = vmatpush1.bf16.msra.mxu1 %v640_v16 }
  0x66   :  { %274 = vmatprep.subr.bf16.mxu1 %v641_v17  ;;  %586 = vmatpush3.bf16.msra.mxu0 %v655_v40 }
  0x67   :  { %587 = vmatprep.subr.bf16.mxu0 %v656_v41 }
  0x69   :  { %275 = vmatpush1.bf16.msra.mxu1 %v643_v18 }
  0x6a   :  { %588 = vmatpush3.bf16.msra.mxu0 %v657_v42 }
  0x6b   :  { %589 = vmatprep.subr.bf16.mxu0 %v658_v43 }
  0x6e   :  { %590 = vmatpush3.bf16.msra.mxu0 %v659_v44 }
 0x122   :  { %v143_v32 = vpop.f32.mrb[0].mxu0 }
 0x123   :  { %v601_v33 = vpop.f32.mrb[1].mxu0  ;;  %v144_v35 = vadd.f32 %v536_v31, %v143_v32 }
 0x124   :  { %v146_v34 = vpop.f32.mrb[2].mxu0 }
 0x125   :  { %v147_v36 = vadd.f32 %v536_v31, %v146_v34  ;;  %v602_v37 = vpop.f32.mrb[3].mxu0 }
 0x127   :  { %v150_v38 = vpack.c.bf16 %v147_v36, %v144_v35 }
 0x129   :  { %v151_v39 = vmax.bf16 %v788_v19, %v150_v38 }
 0x12b   :  { %293 = vmatmul.mubr.bf16.vlgmr.msra.gmra.mrb[0].mxu1 %v151_v39 }
 0x1fe   :  { %v294_v51 = vpop.f32.mrb[0].mxu1 }
 0x1ff   :  { %v296_v53 = vpop.f32.mrb[1].mxu1  ;;  %v295_v55 = vadd.f32 %v294_v51, %v173_v50 }
 0x200   :  { %v298_v54 = vpop.f32.mrb[2].mxu1  ;;  %v297_v58 = vadd.f32 %v296_v53, %v177_v52 }
 0x201   :  { %v299_v56 = vadd.f32 %v298_v54, %v173_v50  ;;  %v300_v57 = vpop.f32.mrb[3].mxu1 }
 0x202   :  { %v301_v59 = vadd.f32 %v300_v57, %v177_v52 }
 0x203   :  { %v303_v60 = vpack.c.bf16 %v299_v56, %v295_v55 }
 0x204   :  { %v304_v61 = vpack.c.bf16 %v301_v59, %v297_v58 }
 0x205   :  { %v305_v63 = vmax.bf16 %v788_v19, %v303_v60 }
 0x206   :  { %v306_v62 = vmax.bf16 %v788_v19, %v304_v61 }
 0x208   :  { %474 = vmatprep.mubr.bf16.mxu0 %v306_v62 }
 0x209   :  { %475 = vmatmul.mubr.bf16.vlgmr.msra.gmra.mrb[4].mxu0 %v305_v63 }
 0x2dc   :  { %v591_v1 = vpop.f32.mrb[4].mxu0 }
 0x2dd   :  { %v592_v3 = vpop.f32.mrb[5].mxu0 }
 0x2de   :  { %v593_v4 = vadd.f32 %v592_v3, %v591_v1  ;;  %v594_v5 = vpop.f32.mrb[6].mxu0 }
 0x2df   :  { %v595_v6 = vpop.f32.mrb[7].mxu0 }
 0x2e0   :  { %v477_v7 = vadd.f32 %v593_v4, %v556_v2  ;;  %v596_v8 = vadd.f32 %v595_v6, %v594_v5 }
 0x2e2   :  { %493 = vperm.xlu1 %616, %v477_v7   ;;  %483 = vadd.xlane.f32.xlu0 %v477_v7  ;;  %v480_v9 = vadd.f32 %v596_v8, %v556_v2 }
 0x2e6   :  { %498 = vperm.xlu1 %616, %v480_v9   ;;  %485 = vadd.xlane.f32.xlu0 %v480_v9 }
 0x361   :  { %v494_v16 = vpop.permute.xlu1 %493 }
 0x362   :  { %v501_v17 = vadd.f32 %v494_v16, %v477_v7 }
 0x365   :  { %v499_v18 = vpop.permute.xlu1 %498 }
 0x366   :  { %v502_v21 = vadd.f32 %v499_v18, %v480_v9 }
 0x36f   :  { %v484_v10 = vpop.xlane.xlu0 %483 }
 0x370   :  { %v487_v11 = vsub.f32 %v484_v10, %v477_v7 }
 0x372   :  { %v489_v12 = vmul.f32 0.16666667, %v487_v11 }
 0x373   :  { %v486_v13 = vpop.xlane.xlu0 %485 }
 0x374   :  { %v488_v14 = vsub.f32 %v486_v13, %v480_v9  ;;  %505 = vperm.xlu0 %617, %v489_v12  }
 0x376   :  { %v490_v15 = vmul.f32 0.16666667, %v488_v14 }
 0x378   :  { %510 = vperm.xlu1 %616, %v490_v15  }
 0x3f3   :  { %v506_v19 = vpop.permute.xlu0 %505 }
 0x3f4   :  { %v513_v20 = vsub.f32 %v501_v17, %v506_v19 }
 0x3f6   :  { %515 = vst [vmem:[#allocation10] sm:$0xff] %v513_v20 }
 0x3f7   :  { %v511_v22 = vpop.permute.xlu1 %510 }
 0x3f8   :  { %v514_v23 = vsub.f32 %v502_v21, %v511_v22 }
 0x3fa   :  { %516 = vst [vmem:[#allocation10 + $0x8] sm:$0xff] %v514_v23 }
 0x3fb   :  { %759 = shalt.err (!%p756_p8)
}
 0x3fc   :  { %s760_s11 = scalar_lea.hbm %s929_s7, 256 }
 0x3fd   :  { %p761_p9 = scmp.ne.s32.totalorder %s929_s7, %s760_s11  ;;  %p764_p10 = scmp.lt.u32.totalorder %s760_s11, %s929_s7 }
 0x3ff   :  { %p766_p11 = pnand %p764_p10, %p761_p9 }
 0x401   :  { %769 = shalt.err (!%p766_p11)
}
 0x402   :  { %528 = dma.vmem_to_hbm [thread:$0]  %s523_s30, 256, %s929_s7, [#allocation4], %s783_s0, %s783_s0, %s784_s27  }
 0x403   :  { %776 = dma.done.wait [#allocation4], 256  }
 0x404   :  { %777 = vsyncadd [#allocation4], 4294967040 }
 0x405   :  { %532 = vsyncpa [#allocation3], 1 }
 0x406   :  { %533 = vsyncpa [#allocation6], 1 }
 0x407   :  { %534 = vsyncpa [#allocation9], 1 }
 0x408   :  { %535 = vsyncpa [#allocation4], 1 }

</bundles_post_ra>
